<compile_context>
chip_gen: v7x
topology: tpu7x:2x2x1
jax: 0.10.0
libtpu: 0.0.40
codegen_flags: <defaults>
</compile_context>

<pallas_src>
import functools

import jax
import jax.numpy as jnp
from jax.experimental import pallas as pl
from jax.experimental.pallas import tpu as pltpu


def init_encoder_params(weight, bias, *, W, stride=2, padding=1):
    """One-time (hoisted) parameter preparation.

    weight: (E, C, kh, kw) PyTorch Conv2d layout.  bias: (E,).
    Returns:
      w_bd: (kh*kw, W_out*C, W_out*E) block-diagonal per-tap weights
            w_bd[t, j*C + c, k*E + e] = (j == k) * weight[e, c, di, dj],  t = di*kw+dj
      b_bd: (1, W_out*E) column-tiled bias
    """
    E, C, kh, kw = weight.shape
    W_out = (W + 2 * padding - kw) // stride + 1
    # (E, C, kh, kw) -> (kh, kw, C, E) -> (taps, C, E)
    w_taps = jnp.transpose(weight, (2, 3, 1, 0)).reshape(kh * kw, C, E)
    eye_j = jnp.eye(W_out, dtype=weight.dtype)
    w_bd = jnp.einsum("jk,tce->tjcke", eye_j, w_taps)
    w_bd = w_bd.reshape(kh * kw, W_out * C, W_out * E)
    b_bd = jnp.tile(bias, (W_out,)).reshape(1, W_out * E)
    return w_bd, b_bd


@functools.partial(jax.jit, static_argnames=("kh", "kw", "stride", "padding"))
def cnn_embedding_encoder_fwd(z, w_bd, b_bd, *, kh=3, kw=3, stride=2, padding=1):
    """z: (bs, C, H, W) NCHW -> (bs, num_words, emb_dim)."""
    bs, C, H, W = z.shape
    assert stride == 2, "parity-split im2col path is specialized to stride=2"
    H_out = (H + 2 * padding - kh) // stride + 1
    W_out = (W + 2 * padding - kw) // stride + 1
    P = H_out * W_out
    E = w_bd.shape[2] // W_out
    assert w_bd.shape == (kh * kw, W_out * C, W_out * E)

    Hp, Wp = H + 2 * padding, W + 2 * padding
    Hp2, Wp2 = Hp + (Hp % 2), Wp + (Wp % 2)        # even sizes for the parity split
    Hh, Wh = Hp2 // 2, Wp2 // 2
    # Every (di, dj) tap must land inside the half-resolution planes.
    assert (kh - 1) // 2 + H_out <= Hh and (kw - 1) // 2 + W_out <= Wh

    MO, NO = bs * H_out, W_out * E                 # lane-dense kernel output slab

    # --- per-call host glue: ONE pad + ONE space-to-depth transpose ----------
    #   s[(p*2+q)*bs + b, r, s_*C + c] = z_padded[b, c, 2*r + p, 2*s_ + q]
    zp = jnp.pad(z, ((0, 0), (0, 0),
                     (padding, Hp2 - H - padding),
                     (padding, Wp2 - W - padding)))
    zr = zp.reshape(bs, C, Hh, 2, Wh, 2)           # free split of H, W
    s = jnp.transpose(zr, (3, 5, 0, 2, 4, 1))      # (p, q, b, r, s_, c): one copy
    s = s.reshape(4 * bs, Hh, Wh * C)              # free merges; minor dims (Hh, Wh*C)

    def kernel(s_ref, w_ref, b_ref, o_ref):
        # s_ref: (4*bs, Hh, Wh*C)   parity-split padded activations
        # w_ref: (kh*kw, W_out*C, W_out*E)  block-diagonal per-tap weights
        # b_ref: (1, W_out*E)       tiled bias
        # o_ref: (bs*H_out, W_out*E)
        acc = jnp.zeros((MO, NO), jnp.float32)
        for di in range(kh):                       # unrolled at trace time (9 taps)
            for dj in range(kw):
                t = di * kw + dj
                pq = (di % 2) * 2 + (dj % 2)       # parity plane of this tap
                a, bo = di // 2, dj // 2           # offsets inside the half planes
                x = s_ref[pl.ds(pq * bs, bs),
                          pl.ds(a, H_out),
                          pl.ds(bo * C, W_out * C)]     # (bs, H_out, W_out*C)
                x = x.reshape(MO, W_out * C)            # free leading-dim merge
                acc = acc + jnp.dot(x, w_ref[t],
                                    preferred_element_type=jnp.float32)
        o_ref[...] = (acc + b_ref[...]).astype(o_ref.dtype)

    out = pl.pallas_call(
        kernel,
        out_shape=jax.ShapeDtypeStruct((MO, NO), z.dtype),
        in_specs=[
            pl.BlockSpec(memory_space=pltpu.MemorySpace.VMEM),   # s    (8, 9, 36)
            pl.BlockSpec(memory_space=pltpu.MemorySpace.VMEM),   # w_bd (9, 32, 256)
            pl.BlockSpec(memory_space=pltpu.MemorySpace.VMEM),   # b_bd (1, 256)
        ],
        out_specs=pl.BlockSpec(memory_space=pltpu.MemorySpace.VMEM),
    )(s, w_bd, b_bd)

    # (bs*H_out, W_out*E) -> (bs, P, E): pure view, row-major indices coincide.
    return out.reshape(bs, P, E)


def _reference(z, weight, bias, *, stride=2, padding=1):
    # Pure-JAX reference: conv (NCHW) -> view(bs, E, P) -> transpose(1, 2)
    out = jax.lax.conv_general_dilated(
        z, weight,
        window_strides=(stride, stride),
        padding=((padding, padding), (padding, padding)),
        dimension_numbers=("NCHW", "OIHW", "NCHW"),
    )
    out = out + bias.reshape(1, -1, 1, 1)
    bs, E = out.shape[0], out.shape[1]
    w_emb = out.reshape(bs, E, -1)
    return jnp.transpose(w_emb, (0, 2, 1))


if __name__ == "__main__":
    bs, C, H, W = 2, 4, 16, 16
    emb_dim = 32
    kh = kw = 3
    stride, padding = 2, 1

    key = jax.random.PRNGKey(0)
    kz, kw_key, kb_key = jax.random.split(key, 3)

    z = jax.random.normal(kz, (bs, C, H, W), dtype=jnp.float32)
    fan_in = C * kh * kw
    bound = 1.0 / (fan_in ** 0.5)
    weight = jax.random.uniform(kw_key, (emb_dim, C, kh, kw),
                                minval=-bound, maxval=bound, dtype=jnp.float32)
    bias = jax.random.uniform(kb_key, (emb_dim,),
                              minval=-bound, maxval=bound, dtype=jnp.float32)

    # Hoisted (one-time) parameter prep; only activation-side work runs per call.
    w_bd, b_bd = init_encoder_params(weight, bias, W=W, stride=stride, padding=padding)

    out = cnn_embedding_encoder_fwd(z, w_bd, b_bd,
                                    kh=kh, kw=kw, stride=stride, padding=padding)
    out = jax.block_until_ready(out)

    ref = _reference(z, weight, bias, stride=stride, padding=padding)
    assert out.shape == (bs, (H // 2) * (W // 2), emb_dim), out.shape
    assert jnp.allclose(out, ref, atol=1e-4, rtol=1e-4), \
        float(jnp.max(jnp.abs(out - ref)))

    print("KERNEL_OK")
</pallas_src>

<mosaic_0001>
module attributes {stable_mosaic.version = 11 : i64} {
  func.func @kernel(%arg0: memref<8x9x36xf32, #tpu.memory_space<vmem>>, %arg1: memref<9x32x256xf32, #tpu.memory_space<vmem>>, %arg2: memref<1x256xf32, #tpu.memory_space<vmem>>, %arg3: memref<16x256xf32, #tpu.memory_space<vmem>>) attributes {dimension_semantics = [], scalar_prefetch = 0 : i64, scratch_operands = 0 : i64, tpu.core_type = #tpu.core_type<tc>} {
    %cst = arith.constant 0.000000e+00 : f32
    %0 = vector.broadcast %cst : f32 to vector<16x256xf32>
    %c0 = arith.constant 0 : index
    %c0_0 = arith.constant 0 : index
    %c0_1 = arith.constant 0 : index
    %1 = vector.load %arg0[%c0, %c0_0, %c0_1] : memref<8x9x36xf32, #tpu.memory_space<vmem>>, vector<2x8x32xf32>
    %2 = vector.shape_cast %1 : vector<2x8x32xf32> to vector<16x32xf32>
    %c0_2 = arith.constant 0 : index
    %c0_3 = arith.constant 0 : index
    %c0_4 = arith.constant 0 : index
    %3 = vector.load %arg1[%c0_2, %c0_3, %c0_4] : memref<9x32x256xf32, #tpu.memory_space<vmem>>, vector<1x32x256xf32>
    %4 = vector.shape_cast %3 : vector<1x32x256xf32> to vector<32x256xf32>
    %cst_5 = arith.constant dense<0.000000e+00> : vector<16x256xf32>
    %5 = tpu.matmul %2, %4, %cst_5 {dimension_numbers = #tpu.dot_dimension_numbers<[1], [0], [0], [1], [0, 0, 1, 1], [], []>} : vector<16x32xf32>, vector<32x256xf32>, vector<16x256xf32> -> vector<16x256xf32>
    %6 = arith.addf %0, %5 : vector<16x256xf32>
    %c2 = arith.constant 2 : index
    %c0_6 = arith.constant 0 : index
    %c0_7 = arith.constant 0 : index
    %7 = vector.load %arg0[%c2, %c0_6, %c0_7] : memref<8x9x36xf32, #tpu.memory_space<vmem>>, vector<2x8x32xf32>
    %8 = vector.shape_cast %7 : vector<2x8x32xf32> to vector<16x32xf32>
    %c1 = arith.constant 1 : index
    %c0_8 = arith.constant 0 : index
    %c0_9 = arith.constant 0 : index
    %9 = vector.load %arg1[%c1, %c0_8, %c0_9] : memref<9x32x256xf32, #tpu.memory_space<vmem>>, vector<1x32x256xf32>
    %10 = vector.shape_cast %9 : vector<1x32x256xf32> to vector<32x256xf32>
    %cst_10 = arith.constant dense<0.000000e+00> : vector<16x256xf32>
    %11 = tpu.matmul %8, %10, %cst_10 {dimension_numbers = #tpu.dot_dimension_numbers<[1], [0], [0], [1], [0, 0, 1, 1], [], []>} : vector<16x32xf32>, vector<32x256xf32>, vector<16x256xf32> -> vector<16x256xf32>
    %12 = arith.addf %6, %11 : vector<16x256xf32>
    %c0_11 = arith.constant 0 : index
    %c0_12 = arith.constant 0 : index
    %c4 = arith.constant 4 : index
    %13 = vector.load %arg0[%c0_11, %c0_12, %c4] : memref<8x9x36xf32, #tpu.memory_space<vmem>>, vector<2x8x32xf32>
    %14 = vector.shape_cast %13 : vector<2x8x32xf32> to vector<16x32xf32>
    %c2_13 = arith.constant 2 : index
    %c0_14 = arith.constant 0 : index
    %c0_15 = arith.constant 0 : index
    %15 = vector.load %arg1[%c2_13, %c0_14, %c0_15] : memref<9x32x256xf32, #tpu.memory_space<vmem>>, vector<1x32x256xf32>
    %16 = vector.shape_cast %15 : vector<1x32x256xf32> to vector<32x256xf32>
    %cst_16 = arith.constant dense<0.000000e+00> : vector<16x256xf32>
    %17 = tpu.matmul %14, %16, %cst_16 {dimension_numbers = #tpu.dot_dimension_numbers<[1], [0], [0], [1], [0, 0, 1, 1], [], []>} : vector<16x32xf32>, vector<32x256xf32>, vector<16x256xf32> -> vector<16x256xf32>
    %18 = arith.addf %12, %17 : vector<16x256xf32>
    %c4_17 = arith.constant 4 : index
    %c0_18 = arith.constant 0 : index
    %c0_19 = arith.constant 0 : index
    %19 = vector.load %arg0[%c4_17, %c0_18, %c0_19] : memref<8x9x36xf32, #tpu.memory_space<vmem>>, vector<2x8x32xf32>
    %20 = vector.shape_cast %19 : vector<2x8x32xf32> to vector<16x32xf32>
    %c3 = arith.constant 3 : index
    %c0_20 = arith.constant 0 : index
    %c0_21 = arith.constant 0 : index
    %21 = vector.load %arg1[%c3, %c0_20, %c0_21] : memref<9x32x256xf32, #tpu.memory_space<vmem>>, vector<1x32x256xf32>
    %22 = vector.shape_cast %21 : vector<1x32x256xf32> to vector<32x256xf32>
    %cst_22 = arith.constant dense<0.000000e+00> : vector<16x256xf32>
    %23 = tpu.matmul %20, %22, %cst_22 {dimension_numbers = #tpu.dot_dimension_numbers<[1], [0], [0], [1], [0, 0, 1, 1], [], []>} : vector<16x32xf32>, vector<32x256xf32>, vector<16x256xf32> -> vector<16x256xf32>
    %24 = arith.addf %18, %23 : vector<16x256xf32>
    %c6 = arith.constant 6 : index
    %c0_23 = arith.constant 0 : index
    %c0_24 = arith.constant 0 : index
    %25 = vector.load %arg0[%c6, %c0_23, %c0_24] : memref<8x9x36xf32, #tpu.memory_space<vmem>>, vector<2x8x32xf32>
    %26 = vector.shape_cast %25 : vector<2x8x32xf32> to vector<16x32xf32>
    %c4_25 = arith.constant 4 : index
    %c0_26 = arith.constant 0 : index
    %c0_27 = arith.constant 0 : index
    %27 = vector.load %arg1[%c4_25, %c0_26, %c0_27] : memref<9x32x256xf32, #tpu.memory_space<vmem>>, vector<1x32x256xf32>
    %28 = vector.shape_cast %27 : vector<1x32x256xf32> to vector<32x256xf32>
    %cst_28 = arith.constant dense<0.000000e+00> : vector<16x256xf32>
    %29 = tpu.matmul %26, %28, %cst_28 {dimension_numbers = #tpu.dot_dimension_numbers<[1], [0], [0], [1], [0, 0, 1, 1], [], []>} : vector<16x32xf32>, vector<32x256xf32>, vector<16x256xf32> -> vector<16x256xf32>
    %30 = arith.addf %24, %29 : vector<16x256xf32>
    %c4_29 = arith.constant 4 : index
    %c0_30 = arith.constant 0 : index
    %c4_31 = arith.constant 4 : index
    %31 = vector.load %arg0[%c4_29, %c0_30, %c4_31] : memref<8x9x36xf32, #tpu.memory_space<vmem>>, vector<2x8x32xf32>
    %32 = vector.shape_cast %31 : vector<2x8x32xf32> to vector<16x32xf32>
    %c5 = arith.constant 5 : index
    %c0_32 = arith.constant 0 : index
    %c0_33 = arith.constant 0 : index
    %33 = vector.load %arg1[%c5, %c0_32, %c0_33] : memref<9x32x256xf32, #tpu.memory_space<vmem>>, vector<1x32x256xf32>
    %34 = vector.shape_cast %33 : vector<1x32x256xf32> to vector<32x256xf32>
    %cst_34 = arith.constant dense<0.000000e+00> : vector<16x256xf32>
    %35 = tpu.matmul %32, %34, %cst_34 {dimension_numbers = #tpu.dot_dimension_numbers<[1], [0], [0], [1], [0, 0, 1, 1], [], []>} : vector<16x32xf32>, vector<32x256xf32>, vector<16x256xf32> -> vector<16x256xf32>
    %36 = arith.addf %30, %35 : vector<16x256xf32>
    %c0_35 = arith.constant 0 : index
    %c1_36 = arith.constant 1 : index
    %c0_37 = arith.constant 0 : index
    %37 = vector.load %arg0[%c0_35, %c1_36, %c0_37] : memref<8x9x36xf32, #tpu.memory_space<vmem>>, vector<2x8x32xf32>
    %38 = vector.shape_cast %37 : vector<2x8x32xf32> to vector<16x32xf32>
    %c6_38 = arith.constant 6 : index
    %c0_39 = arith.constant 0 : index
    %c0_40 = arith.constant 0 : index
    %39 = vector.load %arg1[%c6_38, %c0_39, %c0_40] : memref<9x32x256xf32, #tpu.memory_space<vmem>>, vector<1x32x256xf32>
    %40 = vector.shape_cast %39 : vector<1x32x256xf32> to vector<32x256xf32>
    %cst_41 = arith.constant dense<0.000000e+00> : vector<16x256xf32>
    %41 = tpu.matmul %38, %40, %cst_41 {dimension_numbers = #tpu.dot_dimension_numbers<[1], [0], [0], [1], [0, 0, 1, 1], [], []>} : vector<16x32xf32>, vector<32x256xf32>, vector<16x256xf32> -> vector<16x256xf32>
    %42 = arith.addf %36, %41 : vector<16x256xf32>
    %c2_42 = arith.constant 2 : index
    %c1_43 = arith.constant 1 : index
    %c0_44 = arith.constant 0 : index
    %43 = vector.load %arg0[%c2_42, %c1_43, %c0_44] : memref<8x9x36xf32, #tpu.memory_space<vmem>>, vector<2x8x32xf32>
    %44 = vector.shape_cast %43 : vector<2x8x32xf32> to vector<16x32xf32>
    %c7 = arith.constant 7 : index
    %c0_45 = arith.constant 0 : index
    %c0_46 = arith.constant 0 : index
    %45 = vector.load %arg1[%c7, %c0_45, %c0_46] : memref<9x32x256xf32, #tpu.memory_space<vmem>>, vector<1x32x256xf32>
    %46 = vector.shape_cast %45 : vector<1x32x256xf32> to vector<32x256xf32>
    %cst_47 = arith.constant dense<0.000000e+00> : vector<16x256xf32>
    %47 = tpu.matmul %44, %46, %cst_47 {dimension_numbers = #tpu.dot_dimension_numbers<[1], [0], [0], [1], [0, 0, 1, 1], [], []>} : vector<16x32xf32>, vector<32x256xf32>, vector<16x256xf32> -> vector<16x256xf32>
    %48 = arith.addf %42, %47 : vector<16x256xf32>
    %c0_48 = arith.constant 0 : index
    %c1_49 = arith.constant 1 : index
    %c4_50 = arith.constant 4 : index
    %49 = vector.load %arg0[%c0_48, %c1_49, %c4_50] : memref<8x9x36xf32, #tpu.memory_space<vmem>>, vector<2x8x32xf32>
    %50 = vector.shape_cast %49 : vector<2x8x32xf32> to vector<16x32xf32>
    %c8 = arith.constant 8 : index
    %c0_51 = arith.constant 0 : index
    %c0_52 = arith.constant 0 : index
    %51 = vector.load %arg1[%c8, %c0_51, %c0_52] : memref<9x32x256xf32, #tpu.memory_space<vmem>>, vector<1x32x256xf32>
    %52 = vector.shape_cast %51 : vector<1x32x256xf32> to vector<32x256xf32>
    %cst_53 = arith.constant dense<0.000000e+00> : vector<16x256xf32>
    %53 = tpu.matmul %50, %52, %cst_53 {dimension_numbers = #tpu.dot_dimension_numbers<[1], [0], [0], [1], [0, 0, 1, 1], [], []>} : vector<16x32xf32>, vector<32x256xf32>, vector<16x256xf32> -> vector<16x256xf32>
    %54 = arith.addf %48, %53 : vector<16x256xf32>
    %c0_54 = arith.constant 0 : index
    %c0_55 = arith.constant 0 : index
    %55 = vector.load %arg2[%c0_54, %c0_55] : memref<1x256xf32, #tpu.memory_space<vmem>>, vector<1x256xf32>
    %56 = vector.broadcast %55 : vector<1x256xf32> to vector<16x256xf32>
    %57 = arith.addf %54, %56 : vector<16x256xf32>
    %c0_56 = arith.constant 0 : index
    %c0_57 = arith.constant 0 : index
    %58 = vector.load %arg3[%c0_56, %c0_57] : memref<16x256xf32, #tpu.memory_space<vmem>>, vector<16x256xf32>
    tpu.vector_store %arg3[%c0_56, %c0_57], %57 {strides = array<i32>} : memref<16x256xf32, #tpu.memory_space<vmem>>, vector<16x256xf32>,
    return
  }
}

</mosaic_0001>

<bundles_post_ra>
// kernel: cnn_embedding_encoder_fwd.1
= control target key start
LH: loop header
LB: loop body
LE: loop exit
PB: predicated region body
PF: predicated region fallthrough
CT: control target
= control target key end

     0   :  { %v1115_v2 = vmov 0.0   ;;  %s1116_s16 = smov 124   ;;  %vm36_vm0 = vcmask 261120   ;;  %s1470_s0 = inlined_call_operand.vmem [shape: f32[8,9,36], index: 0, kind: input, shape index: {}]   ;;  %s1471_s1 = inlined_call_operand.vmem [shape: f32[9,32,256], index: 1, kind: input, shape index: {}]   ;;  %s1472_s2 = inlined_call_operand.vmem [shape: f32[1,256], index: 2, kind: input, shape index: {}]   ;;  %s1473_s3 = inlined_call_operand.vmem [shape: f32[16,256], index: 3, kind: output, shape index: {}]  }
   0x1   :  { %v1140_v0 = vld [vmem:[%s1470_s0 + $0x40] sm:$0xff]  ;;  %107 = vmatprep.mubr.f32.mxu1 %v1115_v2  ;;  %482 = vmatprep.mubr.f32.mxu0 %v1115_v2  ;;  %v1156_v3 = vld [vmem:[%s1470_s0 + $0x50] sm:$0xff]  ;;  %v918_v5 = vld [vmem:[%s1471_s1 + $0x48] sm:$0xff] }
   0x2   :  { %v1145_v1 = vld [vmem:[%s1470_s0] sm:$0xff]  ;;  %508 = vrot.lane.b32.xlu0 %v1140_v0, %s1116_s16  ;;  %v1161_v4 = vld [vmem:[%s1470_s0 + $0x10] sm:$0xff]  ;;  %v920_v6 = vld [vmem:[%s1471_s1 + $0x58] sm:$0xff] }
   0x3   :  { %212 = vrot.lane.b32.xlu1 %v1145_v1, %s1116_s16  ;;  %v1005_v7 = vpack.c.bf16 %v920_v6, %v918_v5  ;;  %v917_v8 = vld [vmem:[%s1471_s1 + $0x40] sm:$0xff]  ;;  %v919_v9 = vld [vmem:[%s1471_s1 + $0x50] sm:$0xff]  ;;  %v922_v10 = vld [vmem:[%s1471_s1 + $0x68] sm:$0xff] }
   0x4   :  { %v1181_v11 = vld [vmem:[%s1470_s0 + $0x11] sm:$0xff]  ;;  %v1007_v12 = vpack.c.bf16 %v919_v9, %v917_v8  ;;  %v921_v14 = vld [vmem:[%s1471_s1 + $0x60] sm:$0xff]  ;;  %v954_v17 = vld [vmem:[%s1471_s1 + $0x108] sm:$0xff] }
   0x5   :  { %v924_v13 = vld [vmem:[%s1471_s1 + $0x78] sm:$0xff]  ;;  %v923_v15 = vld [vmem:[%s1471_s1 + $0x70] sm:$0xff]  ;;  %v1205_v19 = vld [vmem:[%s1470_s0 + $0x1] sm:$0xff]  ;;  %1006 = vmatprep.subr.bf16.mxu1 %v1005_v7 }
   0x6   :  { %510 = vrot.lane.b32.xlu0 %v1156_v3, %s1116_s16  ;;  %v1009_v16 = vpack.c.bf16 %v924_v13, %v922_v10  ;;  %v956_v18 = vld [vmem:[%s1471_s1 + $0x118] sm:$0xff]  ;;  %v17_v21 = vld [vmem:[%s1471_s1 + $0x8] sm:$0xff]  ;;  %1008 = vmatpush1.bf16.msra.mxu1 %v1007_v12  ;;  %v1011_v23 = vpack.c.bf16 %v923_v15, %v921_v14  ;;  %v953_v24 = vld [vmem:[%s1471_s1 + $0x100] sm:$0xff] }
   0x7   :  { %214 = vrot.lane.b32.xlu1 %v1161_v4, %s1116_s16  ;;  %v1037_v20 = vpack.c.bf16 %v956_v18, %v954_v17  ;;  %v19_v22 = vld [vmem:[%s1471_s1 + $0x18] sm:$0xff]  ;;  %v955_v25 = vld [vmem:[%s1471_s1 + $0x110] sm:$0xff]  ;;  %v16_v26 = vld [vmem:[%s1471_s1] sm:$0xff] }
   0x8   :  { %1010 = vmatprep.subr.bf16.mxu1 %v1009_v16  ;;  %v1013_v27 = vpack.c.bf16 %v19_v22, %v17_v21  ;;  %v1039_v28 = vpack.c.bf16 %v955_v25, %v953_v24  ;;  %v18_v29 = vld [vmem:[%s1471_s1 + $0x10] sm:$0xff]  ;;  %v958_v30 = vld [vmem:[%s1471_s1 + $0x128] sm:$0xff]  ;;  %v960_v31 = vld [vmem:[%s1471_s1 + $0x138] sm:$0xff] }
   0x9   :  { %1038 = vmatprep.subr.bf16.mxu0 %v1037_v20  ;;  %v1041_v32 = vpack.c.bf16 %v960_v31, %v958_v30  ;;  %v21_v33 = vld [vmem:[%s1471_s1 + $0x28] sm:$0xff]  ;;  %v23_v34 = vld [vmem:[%s1471_s1 + $0x38] sm:$0xff]  ;;  %v957_v35 = vld [vmem:[%s1471_s1 + $0x120] sm:$0xff]  ;;  %v1015_v38 = vpack.c.bf16 %v18_v29, %v16_v26 }
   0xa   :  { %802 = vrot.lane.b32.xlu0 %v1205_v19, %s1116_s16  ;;  %1040 = vmatpush1.bf16.msra.mxu0 %v1039_v28  ;;  %v959_v36 = vld [vmem:[%s1471_s1 + $0x130] sm:$0xff]  ;;  %v915_v37 = vld [vmem:[%s1470_s0 + $0x20] sm:$0xff]  ;;  %v964_v41 = vld [vmem:[%s1471_s1 + $0x148] sm:$0xff]  ;;  %v1017_v42 = vpack.c.bf16 %v23_v34, %v21_v33 }
   0xb   :  { %804 = vrot.lane.b32.xlu1 %v1181_v11, %s1116_s16  ;;  %1012 = vmatpush1.bf16.msra.mxu1 %v1011_v23  ;;  %v1043_v39 = vpack.c.bf16 %v959_v36, %v957_v35  ;;  %v20_v40 = vld [vmem:[%s1471_s1 + $0x20] sm:$0xff]  ;;  %v22_v43 = vld [vmem:[%s1471_s1 + $0x30] sm:$0xff]  ;;  %v966_v44 = vld [vmem:[%s1471_s1 + $0x158] sm:$0xff] }
   0xc   :  { %1042 = vmatprep.subr.bf16.mxu0 %v1041_v32  ;;  %1014 = vmatprep.subr.bf16.mxu1 %v1013_v27  ;;  %v930_v45 = vld [vmem:[%s1471_s1 + $0x88] sm:$0xff]  ;;  %v1045_v46 = vpack.c.bf16 %v966_v44, %v964_v41  ;;  %v932_v47 = vld [vmem:[%s1471_s1 + $0x98] sm:$0xff]  ;;  %v963_v48 = vld [vmem:[%s1471_s1 + $0x140] sm:$0xff]  ;;  %v1019_v54 = vpack.c.bf16 %v22_v43, %v20_v40 }
   0xd   :  { %v965_v49 = vld [vmem:[%s1471_s1 + $0x150] sm:$0xff]  ;;  %v951_v50 = vld [vmem:[%s1470_s0 + $0x60] sm:$0xff]  ;;  %v968_v52 = vld [vmem:[%s1471_s1 + $0x168] sm:$0xff]  ;;  %v1021_v57 = vpack.c.bf16 %v932_v47, %v930_v45 }
   0xe   :  { %925 = vmatmul.mubr.msk.f32.vlgmr.msra.gmra.mrb[0].mxu1 %vm36_vm0, %v915_v37  ;;  %1044 = vmatpush1.bf16.msra.mxu0 %v1043_v39  ;;  %v1047_v51 = vpack.c.bf16 %v965_v49, %v963_v48  ;;  %v916_v53 = vld [vmem:[%s1470_s0 + $0x30] sm:$0xff]  ;;  %v929_v55 = vld [vmem:[%s1471_s1 + $0x80] sm:$0xff]  ;;  %v970_v56 = vld [vmem:[%s1471_s1 + $0x178] sm:$0xff] }
   0xf   :  { %1016 = vmatpush1.bf16.msra.mxu1 %v1015_v38  ;;  %113 = vmatprep.mubr.f32.mxu1 %v1115_v2  ;;  %v931_v58 = vld [vmem:[%s1471_s1 + $0x90] sm:$0xff]  ;;  %v967_v59 = vld [vmem:[%s1471_s1 + $0x160] sm:$0xff]  ;;  %v1049_v61 = vpack.c.bf16 %v970_v56, %v968_v52  ;;  %v934_v62 = vld [vmem:[%s1471_s1 + $0xa8] sm:$0xff] }
  0x10   :  { %1018 = vmatprep.subr.bf16.mxu1 %v1017_v42  ;;  %1046 = vmatprep.subr.bf16.mxu0 %v1045_v46  ;;  %v969_v60 = vld [vmem:[%s1471_s1 + $0x170] sm:$0xff]  ;;  %v936_v63 = vld [vmem:[%s1471_s1 + $0xb8] sm:$0xff]  ;;  %v974_v7 = vld [vmem:[%s1471_s1 + $0x188] sm:$0xff]  ;;  %v1023_v9 = vpack.c.bf16 %v931_v58, %v929_v55 }
  0x11   :  { %961 = vmatmul.mubr.msk.f32.vlgmr.msra.gmra.mrb[0].mxu0 %vm36_vm0, %v951_v50  ;;  %v952_v5 = vld [vmem:[%s1470_s0 + $0x70] sm:$0xff]  ;;  %v1051_v6 = vpack.c.bf16 %v969_v60, %v967_v59  ;;  %v976_v8 = vld [vmem:[%s1471_s1 + $0x198] sm:$0xff]  ;;  %v1025_v10 = vpack.c.bf16 %v936_v63, %v934_v62  ;;  %v933_v12 = vld [vmem:[%s1471_s1 + $0xa0] sm:$0xff] }
  0x12   :  { %926 = vmatmul.mubr.msk.f32.gmra.mrb[2].mxu1 %vm36_vm0, %v916_v53  ;;  %1048 = vmatpush1.bf16.msra.mxu0 %v1047_v51  ;;  %v935_v13 = vld [vmem:[%s1471_s1 + $0xb0] sm:$0xff]  ;;  %v1053_v14 = vpack.c.bf16 %v976_v8, %v974_v7  ;;  %v942_v15 = vld [vmem:[%s1471_s1 + $0xc8] sm:$0xff]  ;;  %v944_v16 = vld [vmem:[%s1471_s1 + $0xd8] sm:$0xff]  ;;  %v893_v7 = vlaneseq }
  0x13   :  { %1020 = vmatpush1.bf16.msra.mxu1 %v1019_v54  ;;  %190 = vmatprep.mubr.f32.mxu1 %v1115_v2  ;;  %v1027_v17 = vpack.c.bf16 %v935_v13, %v933_v12  ;;  %v1029_v18 = vpack.c.bf16 %v944_v16, %v942_v15  ;;  %v975_v20 = vld [vmem:[%s1471_s1 + $0x190] sm:$0xff]  ;;  %v941_v21 = vld [vmem:[%s1471_s1 + $0xc0] sm:$0xff]  ;;  %v978_v22 = vld [vmem:[%s1471_s1 + $0x1a8] sm:$0xff] }
  0x14   :  { %1022 = vmatprep.subr.bf16.mxu1 %v1021_v57  ;;  %488 = vmatprep.mubr.f32.mxu0 %v1115_v2  ;;  %v980_v23 = vld [vmem:[%s1471_s1 + $0x1b8] sm:$0xff]  ;;  %v946_v24 = vld [vmem:[%s1471_s1 + $0xe8] sm:$0xff]  ;;  %v977_v28 = vld [vmem:[%s1471_s1 + $0x1a0] sm:$0xff] }
  0x15   :  { %1050 = vmatprep.subr.bf16.mxu0 %v1049_v61  ;;  %962 = vmatmul.mubr.msk.f32.gmra.mrb[2].mxu0 %vm36_vm0, %v952_v5  ;;  %v948_v25 = vld [vmem:[%s1471_s1 + $0xf8] sm:$0xff]  ;;  %v1057_v29 = vpack.c.bf16 %v980_v23, %v978_v22  ;;  %v979_v30 = vld [vmem:[%s1471_s1 + $0x1b0] sm:$0xff]  ;;  %v945_v31 = vld [vmem:[%s1471_s1 + $0xe0] sm:$0xff] }
  0x16   :  { %927 = vmatmul.mubr.msk.f32.vlgmr.msra.gmra.mrb[0].mxu1 %vm36_vm0, %v1145_v1  ;;  %1052 = vmatpush1.bf16.msra.mxu0 %v1051_v6  ;;  %v973_v1 = vld [vmem:[%s1471_s1 + $0x180] sm:$0xff]  ;;  %v947_v32 = vld [vmem:[%s1471_s1 + $0xf0] sm:$0xff]  ;;  %v1033_v35 = vpack.c.bf16 %v948_v25, %v946_v24  ;;  %v986_v36 = vld [vmem:[%s1471_s1 + $0x1c8] sm:$0xff]  ;;  %v1059_v40 = vpack.c.bf16 %v979_v30, %v977_v28 }
  0x17   :  { %1024 = vmatpush1.bf16.msra.mxu1 %v1023_v9  ;;  %196 = vmatprep.mubr.f32.mxu1 %v1115_v2  ;;  %v1055_v26 = vpack.c.bf16 %v975_v20, %v973_v1  ;;  %v988_v37 = vld [vmem:[%s1471_s1 + $0x1d8] sm:$0xff]  ;;  %v996_v38 = vld [vmem:[%s1471_s1 + $0x208] sm:$0xff]  ;;  %v1035_v41 = vpack.c.bf16 %v947_v32, %v945_v31  ;;  %v985_v42 = vld [vmem:[%s1471_s1 + $0x1c0] sm:$0xff] }
  0x18   :  { %1026 = vmatprep.subr.bf16.mxu1 %v1025_v10  ;;  %580 = vmatprep.mubr.f32.mxu0 %v1115_v2  ;;  %v998_v39 = vld [vmem:[%s1471_s1 + $0x218] sm:$0xff]  ;;  %v987_v43 = vld [vmem:[%s1471_s1 + $0x1d0] sm:$0xff]  ;;  %v1061_v46 = vpack.c.bf16 %v988_v37, %v986_v36  ;;  %v990_v47 = vld [vmem:[%s1471_s1 + $0x1e8] sm:$0xff]  ;;  %v894_v10 = vshrl.u32 %v893_v7, 7 }
  0x19   :  { %1054 = vmatprep.subr.bf16.mxu0 %v1053_v14  ;;  %v992_v48 = vld [vmem:[%s1471_s1 + $0x1f8] sm:$0xff]  ;;  %v1069_v49 = vpack.c.bf16 %v998_v39, %v996_v38  ;;  %v995_v50 = vld [vmem:[%s1471_s1 + $0x200] sm:$0xff]  ;;  %v997_v51 = vld [vmem:[%s1471_s1 + $0x210] sm:$0xff]  ;;  %v1063_v52 = vpack.c.bf16 %v987_v43, %v985_v42 }
  0x1a   :  { %928 = vmatmul.mubr.msk.f32.gmra.mrb[2].mxu1 %vm36_vm0, %v1161_v4  ;;  %v943_v4 = vld [vmem:[%s1471_s1 + $0xd0] sm:$0xff]  ;;  %v1065_v53 = vpack.c.bf16 %v992_v48, %v990_v47  ;;  %v989_v54 = vld [vmem:[%s1471_s1 + $0x1e0] sm:$0xff]  ;;  %v1071_v56 = vpack.c.bf16 %v997_v51, %v995_v50  ;;  %v1000_v57 = vld [vmem:[%s1471_s1 + $0x228] sm:$0xff]  ;;  %v895_v12 = vsub.s32 0, %v894_v10  ;;  %v899_v15 = vsub.s32 1, %v894_v10 }
  0x1b   :  { %1028 = vmatpush1.bf16.msra.mxu1 %v1027_v17  ;;  %284 = vmatprep.mubr.f32.mxu1 %v1115_v2  ;;  %v1031_v27 = vpack.c.bf16 %v943_v4, %v941_v21  ;;  %v991_v55 = vld [vmem:[%s1471_s1 + $0x1f0] sm:$0xff]  ;;  %v1002_v58 = vld [vmem:[%s1471_s1 + $0x238] sm:$0xff]  ;;  %v999_v59 = vld [vmem:[%s1471_s1 + $0x220] sm:$0xff] }
  0x1c   :  { %1030 = vmatprep.subr.bf16.mxu1 %v1029_v18  ;;  %v1001_v60 = vld [vmem:[%s1471_s1 + $0x230] sm:$0xff]  ;;  %v1067_v61 = vpack.c.bf16 %v991_v55, %v989_v54  ;;  %v1073_v62 = vpack.c.bf16 %v1002_v58, %v1000_v57  ;;  %v891_v14 = vld [vmem:[%s1472_s2] sm:$0x3] }
  0x1d   :  { %v896_v1 = vrot.slane %v891_v14, %v895_v12  ;;  %v900_v21 = vrot.slane %v891_v14, %v899_v15 }
  0x74   :  { %v509_v33 = vpop.permute.xlu0 %508 }
  0x75   :  { %v213_v34 = vpop.permute.xlu1 %212  ;;  %971 = vmatmul.mubr.msk.f32.vlgmr.msra.gmra.mrb[0].mxu0 %vm36_vm0, %v509_v33 }
  0x76   :  { %937 = vmatmul.mubr.msk.f32.vlgmr.msra.gmra.mrb[0].mxu1 %vm36_vm0, %v213_v34  ;;  %1056 = vmatpush1.bf16.msra.mxu0 %v1055_v26 }
  0x77   :  { %1032 = vmatpush1.bf16.msra.mxu1 %v1031_v27  ;;  %586 = vmatprep.mubr.f32.mxu0 %v1115_v2 }
  0x78   :  { %1058 = vmatprep.subr.bf16.mxu0 %v1057_v29  ;;  %v511_v44 = vpop.permute.xlu0 %510  ;;  %290 = vmatprep.mubr.f32.mxu1 %v1115_v2 }
  0x79   :  { %v215_v45 = vpop.permute.xlu1 %214  ;;  %1034 = vmatprep.subr.bf16.mxu1 %v1033_v35  ;;  %972 = vmatmul.mubr.msk.f32.gmra.mrb[2].mxu0 %vm36_vm0, %v511_v44 }
  0x7a   :  { %938 = vmatmul.mubr.msk.f32.gmra.mrb[2].mxu1 %vm36_vm0, %v215_v45  ;;  %1060 = vmatpush1.bf16.msra.mxu0 %v1059_v40 }
  0x7b   :  { %1036 = vmatpush1.bf16.msra.mxu1 %v1035_v41  ;;  %383 = vmatprep.mubr.f32.mxu1 %v1115_v2 }
  0x7c   :  { %678 = vmatprep.mubr.f32.mxu0 %v1115_v2  ;;  %1062 = vmatprep.subr.bf16.mxu0 %v1061_v46 }
  0x7d   :  { %1077 = vmatprep.subr.bf16.mxu1 %v1069_v49  ;;  %981 = vmatmul.mubr.msk.f32.vlgmr.msra.gmra.mrb[0].mxu0 %vm36_vm0, %v1205_v19  ;;  %v983_v19 = vld [vmem:[%s1470_s0 + $0x21] sm:$0xff]  ;;  %v805_v63 = vpop.permute.xlu1 %804 }
  0x7e   :  { %949 = vmatmul.mubr.msk.f32.vlgmr.msra.gmra.mrb[0].mxu1 %vm36_vm0, %v1140_v0  ;;  %1064 = vmatpush1.bf16.msra.mxu0 %v1063_v52  ;;  %v1075_v0 = vpack.c.bf16 %v1001_v60, %v999_v59 }
  0x7f   :  { %389 = vmatprep.mubr.f32.mxu1 %v1115_v2  ;;  %684 = vmatprep.mubr.f32.mxu0 %v1115_v2 }
  0x80   :  { %1066 = vmatprep.subr.bf16.mxu0 %v1065_v53  ;;  %1079 = vmatpush1.bf16.msra.mxu1 %v1071_v56 }
  0x81   :  { %982 = vmatmul.mubr.msk.f32.gmra.mrb[2].mxu0 %vm36_vm0, %v1181_v11  ;;  %1078 = vmatprep.subr.bf16.mxu1 %v1073_v62  ;;  %v803_v11 = vpop.permute.xlu0 %802 }
  0x82   :  { %950 = vmatmul.mubr.msk.f32.gmra.mrb[2].mxu1 %vm36_vm0, %v1156_v3  ;;  %1068 = vmatpush1.bf16.msra.mxu0 %v1067_v61  ;;  %v984_v3 = vld [vmem:[%s1470_s0 + $0x31] sm:$0xff] }
  0x83   :  { %776 = vmatprep.mubr.f32.mxu0 %v1115_v2  ;;  %1070 = vmatprep.subr.bf16.mxu0 %v1069_v49 }
  0x84   :  { %1080 = vmatpush1.bf16.msra.mxu1 %v1075_v0  ;;  %880 = vmatprep.mubr.f32.mxu1 %v1115_v2 }
  0x85   :  { %993 = vmatmul.mubr.msk.f32.vlgmr.msra.gmra.mrb[0].mxu0 %vm36_vm0, %v983_v19 }
  0x86   :  { %1072 = vmatpush1.bf16.msra.mxu0 %v1071_v56  ;;  %782 = vmatprep.mubr.f32.mxu0 %v1115_v2 }
  0x87   :  { %1074 = vmatprep.subr.bf16.mxu0 %v1073_v62  ;;  %1004 = vmatmul.mubr.msk.f32.vlgmr.msra.gmra.mrb[4].mxu1 %vm36_vm0, %v805_v63 }
  0x89   :  { %994 = vmatmul.mubr.msk.f32.gmra.mrb[2].mxu0 %vm36_vm0, %v984_v3 }
  0x8a   :  { %1076 = vmatpush1.bf16.msra.mxu0 %v1075_v0  ;;  %874 = vmatprep.mubr.f32.mxu0 %v1115_v2 }
  0x8d   :  { %1003 = vmatmul.mubr.msk.f32.vlgmr.msra.gmra.mrb[0].mxu0 %vm36_vm0, %v803_v11 }
 0x151   :  { %v385_v5 = vpop.f32.mrb[0].mxu1 }
 0x152   :  { %v387_v6 = vpop.f32.mrb[1].mxu1 }
 0x155   :  { %v391_v8 = vpop.f32.mrb[2].mxu1 }
 0x156   :  { %v393_v9 = vpop.f32.mrb[3].mxu1 }
 0x15a   :  { %v882_v13 = vpop.f32.mrb[4].mxu1 }
 0x15b   :  { %v884_v16 = vpop.f32.mrb[5].mxu1 }
 0x15c   :  { %v784_v17 = vpop.f32.mrb[2].mxu0 }
 0x15d   :  { %v1083_v18 = vadd.f32 %v784_v17, %v391_v8  ;;  %v786_v2 = vpop.f32.mrb[3].mxu0 }
 0x15e   :  { %v1085_v20 = vadd.f32 %v786_v2, %v393_v9 }
 0x15f   :  { %v1084_v4 = vadd.f32 %v1083_v18, %v882_v13 }
 0x160   :  { %v1086_v22 = vadd.f32 %v1085_v20, %v884_v16  ;;  %v876_v23 = vpop.f32.mrb[0].mxu0 }
 0x161   :  { %v905_v24 = vadd.f32 %v1084_v4, %v896_v1  ;;  %v1081_v25 = vadd.f32 %v876_v23, %v385_v5  ;;  %v878_v26 = vpop.f32.mrb[1].mxu0 }
 0x162   :  { %v906_v27 = vadd.f32 %v1086_v22, %v900_v21  ;;  %v1082_v28 = vadd.f32 %v878_v26, %v387_v6 }
 0x163   :  { %909 = vst [vmem:[%s1473_s3 + $0x10] sm:$0xff] %v905_v24  ;;  %v903_v29 = vadd.f32 %v1081_v25, %v896_v1 }
 0x164   :  { %910 = vst [vmem:[%s1473_s3 + $0x18] sm:$0xff] %v906_v27  ;;  %v904_v30 = vadd.f32 %v1082_v28, %v900_v21 }
 0x165   :  { %907 = vst [vmem:[%s1473_s3] sm:$0xff] %v903_v29 }
 0x166   :  { %908 = vst [vmem:[%s1473_s3 + $0x8] sm:$0xff] %v904_v30 }

</bundles_post_ra>
